<compile_context>
chip_gen: v6e
topology: v6e:2x2x1
jax: 0.10.0
libtpu: 0.0.40
codegen_flags: <defaults>
</compile_context>

<pallas_src>
import math

import jax
import jax.numpy as jnp
from jax.experimental import pallas as pl
from jax.experimental.pallas import tpu as pltpu


# --------------------------------------------------------------------------
# Positional-encoding table (matches the PyTorch buffer before unsqueeze).
# --------------------------------------------------------------------------
def _build_pe_table(d_model: int, max_len: int = 5000) -> jnp.ndarray:
    """Sinusoidal table, shape (max_len, d_model), f32.

    Like the canonical PyTorch module, even d_model is assumed; odd d_model is
    handled by truncating the cos columns.
    """
    position = jnp.arange(0, max_len, dtype=jnp.float32)[:, None]          # (L, 1)
    div_term = jnp.exp(
        jnp.arange(0, d_model, 2, dtype=jnp.float32)
        * (-math.log(10000.0) / d_model)
    )                                                                       # (ceil(D/2),)
    angles = position * div_term                                            # (L, ceil(D/2))
    pe = jnp.zeros((max_len, d_model), dtype=jnp.float32)
    pe = pe.at[:, 0::2].set(jnp.sin(angles))
    cos = jnp.cos(angles)
    pe = pe.at[:, 1::2].set(cos[:, : d_model // 2] if d_model % 2 else cos)
    return pe


# --------------------------------------------------------------------------
# Kernels
# --------------------------------------------------------------------------
def _pos_enc_kernel_bcast(x_ref, pe_ref, o_ref):
    # x_ref: (TS, B, D); pe_ref: (TS, D) -- broadcast pe over the batch
    # (sublane) axis.  One VPU add per vreg; the sublane broadcast rides the
    # huge compute slack of this HBM-bound kernel.
    o_ref[...] = x_ref[...] + pe_ref[...][:, None, :]


def _pos_enc_kernel_padded(x_ref, pe_ref, o_ref):
    # Fallback layout: x_ref (TS, B, D); pe_ref (TS, 1, D) (sublane-padded).
    o_ref[...] = x_ref[...] + pe_ref[...]


def _pos_enc_kernel_2d(x_ref, pe_ref, o_ref):
    # Lane-dense small-batch path: both (TS, B*D); plain same-shape add,
    # unmasked full-lane stores.
    o_ref[...] = x_ref[...] + pe_ref[...]


# --------------------------------------------------------------------------
# Tiling / VMEM budgeting helpers
# --------------------------------------------------------------------------
def _round_up(n: int, m: int) -> int:
    return ((n + m - 1) // m) * m


def _budgets() -> tuple[int, int]:
    """(x-block byte budget, cap on vmem_limit_bytes) for this TPU generation."""
    try:
        cap = int(getattr(pltpu.get_tpu_info(), "vmem_capacity_bytes", 64 << 20))
    except Exception:          # interpret mode / very old runtime: be conservative
        cap = 64 << 20
    if cap >= (96 << 20):      # v5e / v6e: 128 MiB physical VMEM
        return 8 << 20, 96 << 20
    return 6 << 20, 48 << 20   # v7x (64 MiB physical) or unknown


def _legalize_seq_tile(ts: int, seq_len: int) -> int:
    """Clamp to [1, seq_len]; multiple of 8 (or the full length) so the 2-D pe /
    lane-dense blocks satisfy the (8, 128) block-shape constraint."""
    ts = int(max(1, min(int(ts), seq_len)))
    if ts == seq_len:
        return ts
    if seq_len >= 8:
        return max(8, (ts // 8) * 8)
    return seq_len            # tiny sequences: single full block


def _choose_seq_tile(seq_len: int, row_bytes_x: int, x_block_budget: int) -> int:
    ts = x_block_budget // max(1, row_bytes_x)
    ts = max(1, min(int(ts), seq_len))
    # Keep >= 2 grid steps whenever the sequence can be split on an 8-row
    # boundary: lets both v7x TensorCores take work and preserves the
    # prefetch/writeback overlap of the pipeline.
    if seq_len >= 16:
        half = max(8, (pl.cdiv(seq_len, 2) // 8) * 8)
        ts = min(ts, half)
    return _legalize_seq_tile(ts, seq_len)


def _vmem_limit(working_set_bytes: int, cap_bytes: int) -> int:
    # 25% headroom for Mosaic-internal scratch, floored at 32 MiB, capped so a
    # v7x kernel (64 MiB physical VMEM) never over-asks.
    return int(min(cap_bytes, max(32 << 20, working_set_bytes * 5 // 4 + (2 << 20))))


# --------------------------------------------------------------------------
# Feature detection for the 2-D pe in-kernel broadcast
# --------------------------------------------------------------------------
_DENSE2D_PE_SUPPORTED: bool | None = None


def _dense2d_pe_supported() -> bool:
    """Probe once whether Mosaic lowers the (TS, D) -> (TS, 1, D) -> (TS, B, D)
    in-kernel broadcast (a sublane relayout). On failure fall back to the
    proven padded (S, 1, D) pe layout."""
    global _DENSE2D_PE_SUPPORTED
    if _DENSE2D_PE_SUPPORTED is None:
        try:
            xp = jnp.arange(8 * 2 * 32, dtype=jnp.float32).reshape(8, 2, 32)
            pp = jnp.arange(8 * 32, dtype=jnp.float32).reshape(8, 32)
            out = pl.pallas_call(
                _pos_enc_kernel_bcast,
                out_shape=jax.ShapeDtypeStruct((8, 2, 32), jnp.float32),
                grid_spec=pl.GridSpec(
                    grid=(1,),
                    in_specs=[pl.BlockSpec((8, 2, 32), lambda i: (i, 0, 0)),
                              pl.BlockSpec((8, 32), lambda i: (i, 0))],
                    out_specs=pl.BlockSpec((8, 2, 32), lambda i: (i, 0, 0)),
                ),
            )(xp, pp)
            jax.block_until_ready(out)
            _DENSE2D_PE_SUPPORTED = bool(jnp.allclose(out, xp + pp[:, None, :]))
        except Exception:     # LoweringException / NotImplementedError / ...
            _DENSE2D_PE_SUPPORTED = False
    return _DENSE2D_PE_SUPPORTED


# --------------------------------------------------------------------------
# Forward
# --------------------------------------------------------------------------
def positional_encoding_forward(
    x: jnp.ndarray,
    pe_table: jnp.ndarray,
    *,
    seq_tile: int | None = None,
    donate_x: bool = False,
    allow_lane_dense: bool = True,
    pe_mode: str = "auto",            # "auto" | "dense2d" | "padded3d"
) -> jnp.ndarray:
    """x: (seq_len, batch, d_model); pe_table: (max_len, d_model).

    Notes:
      * pe is cast to x.dtype wrapper-side, so for bf16 inputs the add is
        performed in bf16 (differs from PyTorch's f32-buffer add by ~1 ulp).
      * donate_x=True only saves an HBM allocation, not traffic (the kernel
        still reads x and writes out: 2 bytes/elem is the floor), and only
        helps if the caller also donates x at its jit boundary
        (donate_argnums); otherwise XLA inserts a defensive copy.
    """
    if pe_mode not in ("auto", "dense2d", "padded3d"):
        raise ValueError(f"unknown pe_mode: {pe_mode!r}")
    seq_len, batch, d_model = x.shape
    max_len, pe_d = pe_table.shape
    if pe_d != d_model:
        raise ValueError(f"pe_table d_model {pe_d} != input d_model {d_model}")
    if seq_len > max_len:
        raise ValueError(f"seq_len {seq_len} exceeds positional table max_len {max_len}")

    itemsize = jnp.dtype(x.dtype).itemsize
    sub = max(8, 8 * max(1, 4 // itemsize))          # sublane packing: 8 f32 / 16 bf16
    x_budget, vmem_cap = _budgets()
    aliases = {0: 0} if donate_x else {}

    pe2d = pe_table[:seq_len, :].astype(x.dtype)     # (S, D), dense in HBM

    # TODO(synk): optionally generate pe in-kernel (iota + sin/cos keyed off the
    # seq-tile offset) to drop the pe HBM stream entirely once Mosaic
    # guarantees sin/cos lowering.

    # ---- Path 1: lane-dense repack for small batch -------------------------
    # With batch < sublane packing, x/out are sublane-padded 8-16x in the
    # standard layout; repacking to (S, B*D) reads/writes only real bytes.
    if allow_lane_dense and batch < sub and d_model % 128 == 0:
        width = batch * d_model
        x2 = x.reshape(seq_len, width)
        pe_wide = jnp.tile(pe2d, (1, batch))          # (S, B*D), matches x2 flattening
        row = _round_up(width, 128) * itemsize
        ts = (_choose_seq_tile(seq_len, row, x_budget) if seq_tile is None
              else _legalize_seq_tile(seq_tile, seq_len))
        ws = 2 * ts * row * 3                         # x2 + pe_wide + out2, double-buffered
        out2 = pl.pallas_call(
            _pos_enc_kernel_2d,
            out_shape=jax.ShapeDtypeStruct((seq_len, width), x.dtype),
            grid_spec=pl.GridSpec(
                grid=(pl.cdiv(seq_len, ts),),
                in_specs=[pl.BlockSpec((ts, width), lambda i: (i, 0)),
                          pl.BlockSpec((ts, width), lambda i: (i, 0))],
                out_specs=pl.BlockSpec((ts, width), lambda i: (i, 0)),
            ),
            compiler_params=pltpu.CompilerParams(
                dimension_semantics=("parallel",),
                vmem_limit_bytes=_vmem_limit(ws, vmem_cap)),
            input_output_aliases=aliases,
        )(x2, pe_wide)
        return out2.reshape(seq_len, batch, d_model)

    # ---- Path 2: general (seq_tile, batch, d_model) blocks ------------------
    use_dense2d = (pe_mode == "dense2d"
                   or (pe_mode == "auto" and _dense2d_pe_supported()))

    row_x = _round_up(batch, sub) * _round_up(d_model, 128) * itemsize
    ts = (_choose_seq_tile(seq_len, row_x, x_budget) if seq_tile is None
          else _legalize_seq_tile(seq_tile, seq_len))

    if use_dense2d:
        # Dense 2-D pe stream: ~1/B of the x traffic, no sublane padding.
        row_pe = _round_up(d_model, 128) * itemsize
        pe_arg = pe2d                                              # (S, D)
        pe_spec = pl.BlockSpec((ts, d_model), lambda i: (i, 0))
        kernel = _pos_enc_kernel_bcast
    else:
        # Proven fallback: (S, 1, D) pe (sublane-padded, but always lowers).
        row_pe = sub * _round_up(d_model, 128) * itemsize
        pe_arg = pe2d[:, None, :]                                  # (S, 1, D)
        pe_spec = pl.BlockSpec((ts, 1, d_model), lambda i: (i, 0, 0))
        kernel = _pos_enc_kernel_padded

    # Double-buffered x, out and pe blocks (padding-aware accounting).
    ws = 2 * ts * (2 * row_x + row_pe)

    return pl.pallas_call(
        kernel,
        out_shape=jax.ShapeDtypeStruct((seq_len, batch, d_model), x.dtype),
        grid_spec=pl.GridSpec(
            grid=(pl.cdiv(seq_len, ts),),
            in_specs=[pl.BlockSpec((ts, batch, d_model), lambda i: (i, 0, 0)),
                      pe_spec],
            out_specs=pl.BlockSpec((ts, batch, d_model), lambda i: (i, 0, 0)),
        ),
        compiler_params=pltpu.CompilerParams(
            dimension_semantics=("parallel",),      # shardable across v7x's two TCs
            vmem_limit_bytes=_vmem_limit(ws, vmem_cap)),
        input_output_aliases=aliases,
    )(x, pe_arg)


# --------------------------------------------------------------------------
# Demo / self-test
# --------------------------------------------------------------------------
if __name__ == "__main__":
    key = jax.random.PRNGKey(0)
    k1, k2 = jax.random.split(key)
    max_len = 64   # smaller than PyTorch's 5000 for the demo; same construction.

    # Case 1: general path (d_model not a multiple of 128), explicit tiling.
    S, B, D = 16, 2, 32
    x = jax.random.normal(k1, (S, B, D), dtype=jnp.float32)
    pe_tab = _build_pe_table(D, max_len)
    ref = x + pe_tab[:S, :][:, None, :]

    out = jax.block_until_ready(positional_encoding_forward(x, pe_tab, seq_tile=8))
    assert out.shape == (S, B, D)
    assert jnp.allclose(out, ref, atol=1e-6), "mismatch (tiled)"

    # Case 2: auto tile size (generation-aware budget, >= 2 grid steps).
    out_auto = jax.block_until_ready(positional_encoding_forward(x, pe_tab))
    assert jnp.allclose(out_auto, ref, atol=1e-6), "mismatch (auto tile)"

    # Case 3: ragged seq length (partial last tile is masked).
    xr = x[:12]
    out_r = jax.block_until_ready(
        positional_encoding_forward(xr, pe_tab, seq_tile=8))
    assert jnp.allclose(out_r, xr + pe_tab[:12, :][:, None, :], atol=1e-6), \
        "mismatch (ragged)"

    # Case 4: proven padded-pe fallback layout stays correct.
    out_pad = jax.block_until_ready(
        positional_encoding_forward(x, pe_tab, seq_tile=8, pe_mode="padded3d"))
    assert jnp.allclose(out_pad, ref, atol=1e-6), "mismatch (padded3d)"

    # Case 5: lane-dense small-batch repack (d_model % 128 == 0, batch < 8).
    D2 = 128
    x2 = jax.random.normal(k2, (S, B, D2), dtype=jnp.float32)
    pe_tab2 = _build_pe_table(D2, max_len)
    out2 = jax.block_until_ready(positional_encoding_forward(x2, pe_tab2))
    assert jnp.allclose(out2, x2 + pe_tab2[:S, :][:, None, :], atol=1e-6), \
        "mismatch (lane-dense)"

    print("KERNEL_OK")
</pallas_src>

<mosaic_0001>
module attributes {stable_mosaic.version = 11 : i64} {
  func.func @_pos_enc_kernel_bcast(%arg0: i32, %arg1: memref<8x2x32xf32, #tpu.memory_space<vmem>>, %arg2: memref<8x32xf32, #tpu.memory_space<vmem>>, %arg3: memref<8x2x32xf32, #tpu.memory_space<vmem>>) attributes {dimension_semantics = [#tpu.dimension_semantics<arbitrary>], iteration_bounds = array<i64: 1>, scalar_prefetch = 0 : i64, scratch_operands = 0 : i64, tpu.core_type = #tpu.core_type<tc>, window_params = [{transform_indices = @transform_0, window_bounds = array<i64: 8, 2, 32>}, {transform_indices = @transform_1, window_bounds = array<i64: 8, 32>}, {transform_indices = @transform_2, window_bounds = array<i64: 8, 2, 32>}]} {
    %c0 = arith.constant 0 : index
    %c0_0 = arith.constant 0 : index
    %c0_1 = arith.constant 0 : index
    %0 = vector.load %arg1[%c0, %c0_0, %c0_1] : memref<8x2x32xf32, #tpu.memory_space<vmem>>, vector<8x2x32xf32>
    %c0_2 = arith.constant 0 : index
    %c0_3 = arith.constant 0 : index
    %1 = vector.load %arg2[%c0_2, %c0_3] : memref<8x32xf32, #tpu.memory_space<vmem>>, vector<8x32xf32>
    %2 = vector.shape_cast %1 : vector<8x32xf32> to vector<8x1x32xf32>
    %3 = vector.broadcast %2 : vector<8x1x32xf32> to vector<8x2x32xf32>
    %4 = arith.addf %0, %3 : vector<8x2x32xf32>
    %c0_4 = arith.constant 0 : index
    %c0_5 = arith.constant 0 : index
    %c0_6 = arith.constant 0 : index
    %5 = vector.load %arg3[%c0_4, %c0_5, %c0_6] : memref<8x2x32xf32, #tpu.memory_space<vmem>>, vector<8x2x32xf32>
    tpu.vector_store %arg3[%c0_4, %c0_5, %c0_6], %4 {strides = array<i32>} : memref<8x2x32xf32, #tpu.memory_space<vmem>>, vector<8x2x32xf32>,
    return
  }
  func.func @transform_0(%arg0: i32) -> (i32, i32, i32) {
    %c0_i32 = arith.constant 0 : i32
    %c0_i32_0 = arith.constant 0 : i32
    %c0_i32_1 = arith.constant 0 : i32
    return %arg0, %c0_i32, %c0_i32_0 : i32, i32, i32
  }
  func.func @transform_1(%arg0: i32) -> (i32, i32) {
    %c0_i32 = arith.constant 0 : i32
    %c0_i32_0 = arith.constant 0 : i32
    return %arg0, %c0_i32 : i32, i32
  }
  func.func @transform_2(%arg0: i32) -> (i32, i32, i32) {
    %c0_i32 = arith.constant 0 : i32
    %c0_i32_0 = arith.constant 0 : i32
    %c0_i32_1 = arith.constant 0 : i32
    return %arg0, %c0_i32, %c0_i32_0 : i32, i32, i32
  }
}

module attributes {stable_mosaic.version = 11 : i64} {
  func.func @_pos_enc_kernel_padded(%arg0: i32, %arg1: memref<8x2x32xf32, #tpu.memory_space<vmem>>, %arg2: memref<8x1x32xf32, #tpu.memory_space<vmem>>, %arg3: memref<8x2x32xf32, #tpu.memory_space<vmem>>) attributes {dimension_semantics = [#tpu.dimension_semantics<parallel>], iteration_bounds = array<i64: 2>, scalar_prefetch = 0 : i64, scratch_operands = 0 : i64, tpu.core_type = #tpu.core_type<tc>, window_params = [{transform_indices = @transform_0, window_bounds = array<i64: 8, 2, 32>}, {transform_indices = @transform_1, window_bounds = array<i64: 8, 1, 32>}, {transform_indices = @transform_2, window_bounds = array<i64: 8, 2, 32>}]} {
    %c0 = arith.constant 0 : index
    %c0_0 = arith.constant 0 : index
    %c0_1 = arith.constant 0 : index
    %0 = vector.load %arg1[%c0, %c0_0, %c0_1] : memref<8x2x32xf32, #tpu.memory_space<vmem>>, vector<8x2x32xf32>
    %c0_2 = arith.constant 0 : index
    %c0_3 = arith.constant 0 : index
    %c0_4 = arith.constant 0 : index
    %1 = vector.load %arg2[%c0_2, %c0_3, %c0_4] : memref<8x1x32xf32, #tpu.memory_space<vmem>>, vector<8x1x32xf32>
    %2 = vector.broadcast %1 : vector<8x1x32xf32> to vector<8x2x32xf32>
    %3 = arith.addf %0, %2 : vector<8x2x32xf32>
    %c0_5 = arith.constant 0 : index
    %c0_6 = arith.constant 0 : index
    %c0_7 = arith.constant 0 : index
    %4 = vector.load %arg3[%c0_5, %c0_6, %c0_7] : memref<8x2x32xf32, #tpu.memory_space<vmem>>, vector<8x2x32xf32>
    tpu.vector_store %arg3[%c0_5, %c0_6, %c0_7], %3 {strides = array<i32>} : memref<8x2x32xf32, #tpu.memory_space<vmem>>, vector<8x2x32xf32>,
    return
  }
  func.func @transform_0(%arg0: i32) -> (i32, i32, i32) {
    %c0_i32 = arith.constant 0 : i32
    %c0_i32_0 = arith.constant 0 : i32
    %c0_i32_1 = arith.constant 0 : i32
    return %arg0, %c0_i32, %c0_i32_0 : i32, i32, i32
  }
  func.func @transform_1(%arg0: i32) -> (i32, i32, i32) {
    %c0_i32 = arith.constant 0 : i32
    %c0_i32_0 = arith.constant 0 : i32
    %c0_i32_1 = arith.constant 0 : i32
    return %arg0, %c0_i32, %c0_i32_0 : i32, i32, i32
  }
  func.func @transform_2(%arg0: i32) -> (i32, i32, i32) {
    %c0_i32 = arith.constant 0 : i32
    %c0_i32_0 = arith.constant 0 : i32
    %c0_i32_1 = arith.constant 0 : i32
    return %arg0, %c0_i32, %c0_i32_0 : i32, i32, i32
  }
}

</mosaic_0001>

<bundles_post_ra>
// kernel: tpu_custom_call.1
= control target key start
LH: loop header
LB: loop body
LE: loop exit
PB: predicated region body
PF: predicated region fallthrough
CT: control target
= control target key end

     0   :  { %7 = vsyncpa [#allocation3], 0  ;;  %s288_s0 = inlined_call_operand.hbm [shape: f32[8,2,32], index: 0, kind: input, shape index: {}]   ;;  %s289_s1 = inlined_call_operand.hbm [shape: f32[8,32], index: 1, kind: input, shape index: {}]   ;;  %s290_s2 = inlined_call_operand.hbm [shape: f32[8,2,32], index: 2, kind: output, shape index: {}]  }
   0x1   :  { %8 = vsyncpa [#allocation6], 0 }
   0x2   :  { %9 = vsyncpa [#allocation4], 0  ;;  %s244_s9 = smov [#allocation2]  }
   0x3   :  { %s15_s10 = sshll.u32 %s244_s9, 4  ;;  %s16_s10 = int_to_ptr.vmem [resolvable:$true] %s15_s10 }
   0x4   :  { %s186_s11 = scalar_lea.vmem %s16_s10, 256  ;;  %p191_p1 = scmp.lt.s32.totalorder %s16_s10, %s16_s10 }
   0x5   :  { %p187_p0 = scmp.ne.s32.totalorder %s16_s10, %s186_s11  ;;  %p192_p2 = scmp.lt.s32.totalorder %s186_s11, %s186_s11 }
   0x7   :  { %p193_p3 = por %p192_p2, %p191_p1 }
   0x9   :  { %p194_p4 = pnand %p193_p3, %p187_p0 }
   0xb   :  { %197 = shalt.err (!%p194_p4)
}
   0xc   :  { %s245_s12 = smov 32   ;;  %s246_s13 = smov 2  }
   0xd   :  { %21 = dma.hbm_to_vmem [thread:$0]  %s288_s0, 256, %s16_s10, [#allocation3], %s245_s12, %s245_s12, %s246_s13  }
   0xe   :  { %s247_s16 = smov [#allocation5]  }
   0xf   :  { %s28_s17 = sshll.u32 %s247_s16, 4  ;;  %s29_s17 = int_to_ptr.vmem [resolvable:$true] %s28_s17 }
  0x10   :  { %s206_s18 = scalar_lea.vmem %s29_s17, 128  ;;  %p211_p6 = scmp.lt.s32.totalorder %s29_s17, %s29_s17 }
  0x11   :  { %p207_p5 = scmp.ne.s32.totalorder %s29_s17, %s206_s18  ;;  %p212_p7 = scmp.lt.s32.totalorder %s206_s18, %s206_s18 }
  0x13   :  { %p213_p8 = por %p212_p7, %p211_p6 }
  0x15   :  { %p214_p9 = pnand %p213_p8, %p207_p5 }
  0x17   :  { %217 = shalt.err (!%p214_p9)
}
  0x18   :  { %31 = dma.hbm_to_vmem [thread:$0]  %s289_s1, 128, %s29_s17, [#allocation6]  }
  0x19   :  { %238 = dma.done.wait [#allocation3], 256  }
  0x1a   :  { %239 = vsyncadd [#allocation3], 4294967040 }
  0x1b   :  { %240 = dma.done.wait [#allocation6], 128  }
  0x1c   :  { %241 = vsyncadd [#allocation6], 4294967168  ;;  %v52_v0 = vlaneseq  ;;  %v248_v1 = vmov 1966171168   ;;  %v46_v6 = vld [vmem:[#allocation5] sm:$0xff]  ;;  %vm145_vm0 = vcmask 254976  }
  0x1d   :  { %v50_v2 = vunpack.c.l.s4 %v248_v1  ;;  %v48_v9 = vcombine.high %v46_v6, %v46_v6  ;;  %v38_v13 = vld [vmem:[#allocation2] sm:$0x3]  ;;  %v39_v18 = vld [vmem:[#allocation2 + $0x2] sm:$0x3]  ;;  %v40_v19 = vld [vmem:[#allocation2 + $0x4] sm:$0x3] }
  0x1e   :  { %v53_v3 = vshrl.u32 %v52_v0, 7  ;;  %v42_v25 = vld [vmem:[#allocation2 + $0x8] sm:$0x3]  ;;  %v41_v26 = vld [vmem:[#allocation2 + $0x6] sm:$0x3]  ;;  %s249_s0 = smov [#allocation7]  }
  0x1f   :  { %v51_v4 = vunpack.c.0.s8 %v50_v2  ;;  %v43_v33 = vld [vmem:[#allocation2 + $0xa] sm:$0x3]  ;;  %v44_v34 = vld [vmem:[#allocation2 + $0xc] sm:$0x3]  ;;  %v45_v40 = vld [vmem:[#allocation2 + $0xe] sm:$0x3] }
  0x20   :  { %v99_v8 = vsub.s32 0, %v53_v3  ;;  %s159_s1 = sshll.u32 %s249_s0, 4  ;;  %s160_s1 = int_to_ptr.vmem [resolvable:$true] %s159_s1 }
  0x21   :  { %v54_v5 = vsub.s32 %v51_v4, %v53_v3  ;;  %s218_s21 = scalar_lea.vmem %s160_s1, 256  ;;  %p223_p11 = scmp.lt.s32.totalorder %s160_s1, %s160_s1 }
  0x22   :  { %p219_p10 = scmp.ne.s32.totalorder %s160_s1, %s218_s21  ;;  %p224_p12 = scmp.lt.s32.totalorder %s218_s21, %s218_s21 }
  0x23   :  { %v55_v7 = vrot.slane %v46_v6, %v54_v5  ;;  %v62_v12 = vrot.slane %v48_v9, %v54_v5 }
  0x24   :  { %p225_p13 = por %p224_p12, %p223_p11 }
  0x25   :  { %v71_v10 = vrot.slane %v55_v7, %v54_v5  ;;  %v63_v11 = vcombine.high %v55_v7, %v55_v7  ;;  %v78_v17 = vrot.slane %v62_v12, %v54_v5  ;;  %v64_v20 = vcombine.high %v62_v12, %v62_v12 }
  0x26   :  { %p226_p0 = pnand %p225_p13, %p219_p10 }
  0x27   :  { %v100_v14 = vrot.slane %v71_v10, %v99_v8  ;;  %v85_v15 = vrot.slane %v63_v11, %v54_v5  ;;  %v93_v16 = vcombine.high %v71_v10, %v71_v10  ;;  %v116_v27 = vrot.slane %v78_v17, %v99_v8 }
  0x28   :  { %v92_v28 = vrot.slane %v64_v20, %v54_v5  ;;  %v94_v29 = vcombine.high %v78_v17, %v78_v17 }
  0x29   :  { %v137_v21 = vadd.f32 %v100_v14, %v38_v13  ;;  %v104_v22 = vrot.slane %v85_v15, %v99_v8  ;;  %v108_v23 = vrot.slane %v93_v16, %v99_v8  ;;  %v95_v24 = vcombine.high %v85_v15, %v85_v15 }
  0x2a   :  { %v141_v35 = vadd.f32 %v116_v27, %v42_v25  ;;  %v120_v36 = vrot.slane %v92_v28, %v99_v8  ;;  %v124_v37 = vrot.slane %v94_v29, %v99_v8  ;;  %v96_v38 = vcombine.high %v92_v28, %v92_v28 }
  0x2b   :  { %146 = vst.msk [vmem:[#allocation7] sm:$0x3] %vm145_vm0, %v137_v21  ;;  %v138_v30 = vadd.f32 %v104_v22, %v39_v18  ;;  %v139_v31 = vadd.f32 %v108_v23, %v40_v19  ;;  %v112_v32 = vrot.slane %v95_v24, %v99_v8 }
  0x2c   :  { %150 = vst.msk [vmem:[#allocation7 + $0x8] sm:$0x3] %vm145_vm0, %v141_v35  ;;  %v142_v41 = vadd.f32 %v120_v36, %v43_v33  ;;  %v143_v42 = vadd.f32 %v124_v37, %v44_v34  ;;  %v128_v43 = vrot.slane %v96_v38, %v99_v8 }
  0x2d   :  { %147 = vst.msk [vmem:[#allocation7 + $0x2] sm:$0x3] %vm145_vm0, %v138_v30  ;;  %148 = vst.msk [vmem:[#allocation7 + $0x4] sm:$0x3] %vm145_vm0, %v139_v31  ;;  %v140_v39 = vadd.f32 %v112_v32, %v41_v26 }
  0x2e   :  { %151 = vst.msk [vmem:[#allocation7 + $0xa] sm:$0x3] %vm145_vm0, %v142_v41  ;;  %152 = vst.msk [vmem:[#allocation7 + $0xc] sm:$0x3] %vm145_vm0, %v143_v42  ;;  %v144_v44 = vadd.f32 %v128_v43, %v45_v40 }
  0x2f   :  { %149 = vst.msk [vmem:[#allocation7 + $0x6] sm:$0x3] %vm145_vm0, %v140_v39 }
  0x30   :  { %153 = vst.msk [vmem:[#allocation7 + $0xe] sm:$0x3] %vm145_vm0, %v144_v44 }
  0x31   :  { %229 = shalt.err (!%p226_p0)
}
  0x32   :  { %165 = dma.vmem_to_hbm [thread:$0]  %s160_s1, 256, %s290_s2, [#allocation4], %s245_s12, %s245_s12, %s246_s13  }
  0x33   :  { %242 = dma.done.wait [#allocation4], 256  }
  0x34   :  { %243 = vsyncadd [#allocation4], 4294967040 }
  0x35   :  { %169 = vsyncpa [#allocation3], 1 }
  0x36   :  { %170 = vsyncpa [#allocation6], 1 }
  0x37   :  { %171 = vsyncpa [#allocation4], 1 }

// kernel: tpu_custom_call.1
= control target key start
LH: loop header
LB: loop body
LE: loop exit
PB: predicated region body
PF: predicated region fallthrough
CT: control target
= control target key end

     0   :  { %7 = vsyncpa [#allocation3], 0  ;;  %s882_s0 = inlined_call_operand.hbm [shape: f32[16,2,32], index: 0, kind: input, shape index: {}]   ;;  %s883_s1 = inlined_call_operand.hbm [shape: f32[16,1,32], index: 1, kind: input, shape index: {}]   ;;  %s884_s2 = inlined_call_operand.hbm [shape: f32[16,2,32], index: 2, kind: output, shape index: {}]  }
   0x1   :  { %9 = vsyncpa [#allocation3 + $0x1], 0 }
   0x2   :  { %10 = vsyncpa [#allocation6], 0 }
   0x3   :  { %12 = vsyncpa [#allocation6 + $0x1], 0 }
   0x4   :  { %13 = vsyncpa [#allocation4], 0 }
   0x5   :  { %15 = vsyncpa [#allocation4 + $0x1], 0  ;;  %s632_s9 = smov 0   ;;  %s634_s10 = smov 0  }
   0x6   :  { %s636_s11 = smov 0   ;;  %s638_s12 = smov 0  }
   0x7 LB: > { %s653_s13 = sadd.s32 4294967295, %s606_s12   ;;  %s396_s14 = sadd.s32 4294967294, %s606_s12   ;;  %s606_s12 = sphi %s638_s12, %s900_s12   ;;  %s602_s11 = sphi %s636_s11, %s899_s11   ;;  %s598_s10 = sphi %s634_s10, %s898_s10   ;;  %s594_s9 = sphi %s632_s9, %s897_s9  }
   0x8   : > { %s657_s15 = sadd.s32 1, %s606_s12   ;;  %s28_s16 = sadd.s32 1, %s602_s11 }
   0x9   : > { %s25_s17 = ssub.s32 %s606_s12, %s657_s15  ;;  %p35_p0 = scmp.ne.s32.totalorder %s602_s11, %s598_s10 }
   0xa   : > { %p26_p1 = scmp.eq.s32.totalorder %s25_s17, 0  ;;  %p36_p2 = scmp.eq.s32.totalorder %s606_s12, 0 }
   0xb   : > { %p41_p3 = scmp.ne.s32.totalorder %s598_s10, %s594_s9  ;;  %p42_p4 = scmp.eq.s32.totalorder %s653_s13, 0 }
   0xc   : > { %s669_s18 = scalar_select %p26_p1, %s602_s11, %s28_s16  }
   0xd   : > { %p671_p5 = por %p36_p2, %p35_p0  ;;  %p675_p6 = por %p42_p4, %p41_p3 }
   0xe   : > { %p91_p7 = scmp.eq.s32.totalorder %s653_s13, 1  ;;  %p97_p8 = scmp.eq.s32.totalorder %s396_s14, 1 }
   0xf   : > { %s888_s20 = scalar_select %p675_p6, 1, 0 }
  0x10   : > { %p442_p10 = scmp.lt.s32.totalorder %s606_s12, 2  ;;  %p682_p11 = por %p91_p7, %p35_p0 }
  0x11   : > { %p686_p12 = por %p97_p8, %p41_p3  ;;  %s691_s23 = sand.u32 1, %s602_s11  }
  0x12   : > { %s889_s21 = scalar_select %p682_p11, 1, 0 }
  0x13   : > { %s890_s22 = scalar_select %p686_p12, 1, 0 }
  0x14   : > { %s422_s24 = sshll.u32 %s606_s12, 8  ;;  %s399_s25 = sshll.u32 %s691_s23, 4 }
  0x15   : > { %s698_s28 = scalar_lea.hbm %s882_s0, %s422_s24  ;;  %s121_s29 = scalar_lea.vmem [#allocation2], %s399_s25 }
  0x16   : > { %s128_s30 = sshll.u32 %s121_s29, 4  ;;  %p702_p13 = pnand %p442_p10, %p671_p5  ;;  %s706_s30 = int_to_ptr.vmem [resolvable:$true] %s128_s30 }
  0x17   : > { %s118_s4 = scalar_lea.sflag [#allocation3], %s691_s23  ;;  %s482_s5 = scalar_lea.hbm %s698_s28, 256 }
  0x18   : > { %p483_p0 = scmp.ne.s32.totalorder %s698_s28, %s482_s5  ;;  %p484_p1 = pneg %p702_p13 }
  0x19   : > { %s487_s8 = scalar_lea.hbm %s882_s0, 512  ;;  %p488_p4 = scmp.lt.s32.totalorder %s698_s28, %s882_s0 }
  0x1a   : > { %p485_p2 = pnand %p484_p1, %p483_p0  ;;  %p489_p5 = scmp.lt.s32.totalorder %s487_s8, %s482_s5 }
  0x1c   : > { %p486_p3 = pneg %p485_p2  ;;  %p490_p7 = por %p489_p5, %p488_p4 }
  0x1e   : > { %p491_p8 = pnand %p490_p7, %p486_p3 }
  0x20   : > { %494 = shalt.err (!%p491_p8)
}
  0x21   : > { %s495_s17 = scalar_lea.vmem %s706_s30, 256  ;;  %s608_s19 = smov [#allocation2]  }
  0x22   : > { %p496_p10 = scmp.ne.s32.totalorder %s706_s30, %s495_s17  ;;  %s500_s24 = sshll.u32 %s608_s19, 4  ;;  %s501_s24 = int_to_ptr.vmem [resolvable:$false] %s500_s24 }
  0x23   : > { %s502_s25 = scalar_lea.vmem %s501_s24, 512  ;;  %p503_p9 = scmp.lt.s32.totalorder %s706_s30, %s501_s24 }
  0x24   : > { %p498_p0 = pnand %p496_p10, %p484_p1  ;;  %p504_p12 = scmp.lt.s32.totalorder %s502_s25, %s495_s17 }
  0x26   : > { %p499_p2 = pneg %p498_p0  ;;  %p505_p11 = por %p504_p12, %p503_p9 }
  0x28   : > { %p506_p4 = pnand %p505_p11, %p499_p2 }
  0x2a   : > { %509 = shalt.err (!%p506_p4)
}
  0x2b   : > { %s609_s26 = smov 32   ;;  %s610_s27 = smov 2  }
  0x2c   : > { %434 = dma.hbm_to_vmem [thread:$0]  (!%p702_p13), %s698_s28, 256, %s706_s30, %s118_s4, %s609_s26, %s609_s26, %s610_s27  }
  0x2d   : > { %p405_p3 = scmp.ge.s32.totalorder %s606_s12, 1  ;;  %p157_p5 = scmp.lt.s32.totalorder %s606_s12, 3 }
  0x2e   : > { %s402_s29 = sshll.u32 %s691_s23, 3  ;;  %s423_s6 = sshll.u32 %s606_s12, 7 }
  0x2f   : > { %p738_p9 = pnand %p405_p3, %p157_p5  ;;  %s142_s7 = scalar_lea.vmem [#allocation5], %s402_s29 }
  0x30   : > { %s149_s8 = sshll.u32 %s142_s7, 4  ;;  %s746_s17 = scalar_lea.hbm %s883_s1, %s423_s6  ;;  %s748_s8 = int_to_ptr.vmem [resolvable:$true] %s149_s8 }
  0x31   : > { %s139_s28 = scalar_lea.sflag [#allocation6], %s691_s23  ;;  %s510_s30 = scalar_lea.hbm %s746_s17, 128 }
  0x32   : > { %p511_p11 = scmp.ne.s32.totalorder %s746_s17, %s510_s30  ;;  %s515_s24 = scalar_lea.hbm %s883_s1, 256 }
  0x33   : > { %p516_p8 = scmp.lt.s32.totalorder %s746_s17, %s883_s1  ;;  %p517_p10 = scmp.lt.s32.totalorder %s515_s24, %s510_s30 }
  0x34   : > { %p513_p12 = pnand %p511_p11, %p484_p1 }
  0x35   : > { %p518_p0 = por %p517_p10, %p516_p8 }
  0x36   : > { %p514_p7 = pneg %p513_p12 }
  0x38   : > { %p519_p2 = pnand %p518_p0, %p514_p7 }
  0x3a   : > { %522 = shalt.err (!%p519_p2)
}
  0x3b   : > { %s523_s27 = scalar_lea.vmem %s748_s8, 128  ;;  %s611_s29 = smov [#allocation5]  }
  0x3c   : > { %p524_p4 = scmp.ne.s32.totalorder %s748_s8, %s523_s27  ;;  %s528_s6 = sshll.u32 %s611_s29, 4  ;;  %s529_s6 = int_to_ptr.vmem [resolvable:$false] %s528_s6 }
  0x3d   : > { %s530_s7 = scalar_lea.vmem %s529_s6, 256  ;;  %p531_p11 = scmp.lt.s32.totalorder %s748_s8, %s529_s6 }
  0x3e   : > { %p526_p3 = pnand %p524_p4, %p484_p1  ;;  %p532_p12 = scmp.lt.s32.totalorder %s530_s7, %s523_s27 }
  0x40   : > { %p527_p5 = pneg %p526_p3  ;;  %p533_p6 = por %p532_p12, %p531_p11 }
  0x42   : > { %p534_p8 = pnand %p533_p6, %p527_p5 }
  0x44   : > { %537 = shalt.err (!%p534_p8)
}
  0x45   : > { %s612_s14 = smov 16   ;;  %s613_s16 = smov 1  }
  0x46   : > { %437 = dma.hbm_to_vmem [thread:$0]  (!%p702_p13), %s746_s17, 128, %s748_s8, %s139_s28, %s612_s14, %s612_s14, %s613_s16  }
  0x47   : > { %161 = sbr.rel (%p738_p9) target bundleno = 112 (0x70), region = 28  ;;  %s778_s30 = sand.u32 (!%p738_p9), 1, %s598_s10  }
  0x48   : > { %s406_s4 = sshll.u32 (!%p738_p9), %s778_s30, 4  ;;  %s164_s19 = scalar_lea.sflag (!%p738_p9), [#allocation3], %s778_s30 }
  0x49   : > { %s782_s24 = scalar_lea.vmem (!%p738_p9), [#allocation2], %s406_s4  ;;  %p893_p6 = scmp.ne.s32.totalorder (!%p738_p9), %s888_s20, 0 }
  0x4c   : > { %581 = dma.done.wait (%p893_p6), %s164_s19, 256  }
  0x4d   : > { %583 = vsyncadd (%p893_p6), %s164_s19, 4294967040  ;;  %s407_s23 = sshll.u32 %s778_s30, 3  ;;  %s173_s3 = scalar_lea.sflag [#allocation6], %s778_s30 }
  0x4e   : > { %s790_s5 = scalar_lea.vmem [#allocation5], %s407_s23 }
  0x4f   : > { %585 = dma.done.wait (%p893_p6), %s173_s3, 128  }
  0x50   : > { %587 = vsyncadd (%p893_p6), %s173_s3, 4294967168  ;;  %vm277_vm0 = vcmask 254976   ;;  %s796_s8 = scalar_lea.vmem [#allocation7], %s406_s4  ;;  %s424_s28 = sshll.u32 %s653_s13, 8  ;;  %v205_v0 = vld [vmem:[%s782_s24] sm:$0x3] }
  0x51   : > { %s300_s17 = sshll.u32 %s796_s8, 4  ;;  %v409_v1 = vld [vmem:[%s790_s5] ss:$0 sm:$0xff]  ;;  %v206_v2 = vld [vmem:[%s782_s24 + $0x2] sm:$0x3]  ;;  %s831_s26 = scalar_lea.hbm %s884_s2, %s424_s28  ;;  %s821_s17 = int_to_ptr.vmem [resolvable:$true] %s300_s17 }
  0x52   : > { %v269_v3 = vadd.f32 %v409_v1, %v205_v0  ;;  %v410_v4 = vld [vmem:[%s790_s5 + $0x1] ss:$0 sm:$0xff]  ;;  %v207_v5 = vld [vmem:[%s782_s24 + $0x4] sm:$0x3]  ;;  %v411_v6 = vld [vmem:[%s790_s5 + $0x2] ss:$0 sm:$0xff] }
  0x53   : > { %v270_v7 = vadd.f32 %v410_v4, %v206_v2  ;;  %v271_v8 = vadd.f32 %v411_v6, %v207_v5  ;;  %v208_v9 = vld [vmem:[%s782_s24 + $0x6] sm:$0x3]  ;;  %v412_v10 = vld [vmem:[%s790_s5 + $0x3] ss:$0 sm:$0xff]  ;;  %v209_v11 = vld [vmem:[%s782_s24 + $0x8] sm:$0x3] }
  0x54   : > { %278 = vst.msk [vmem:[%s796_s8] sm:$0x3] %vm277_vm0, %v269_v3  ;;  %v272_v12 = vadd.f32 %v412_v10, %v208_v9  ;;  %v413_v13 = vld [vmem:[%s790_s5 + $0x4] ss:$0 sm:$0xff]  ;;  %v210_v14 = vld [vmem:[%s782_s24 + $0xa] sm:$0x3] }
  0x55   : > { %v414_v15 = vld [vmem:[%s790_s5 + $0x5] ss:$0 sm:$0xff]  ;;  %279 = vst.msk [vmem:[%s796_s8 + $0x2] sm:$0x3] %vm277_vm0, %v270_v7  ;;  %280 = vst.msk [vmem:[%s796_s8 + $0x4] sm:$0x3] %vm277_vm0, %v271_v8  ;;  %v273_v16 = vadd.f32 %v413_v13, %v209_v11 }
  0x56   : > { %v274_v17 = vadd.f32 %v414_v15, %v210_v14  ;;  %v211_v18 = vld [vmem:[%s782_s24 + $0xc] sm:$0x3]  ;;  %v415_v19 = vld [vmem:[%s790_s5 + $0x6] ss:$0 sm:$0xff]  ;;  %v212_v20 = vld [vmem:[%s782_s24 + $0xe] sm:$0x3] }
  0x57   : > { %281 = vst.msk [vmem:[%s796_s8 + $0x6] sm:$0x3] %vm277_vm0, %v272_v12  ;;  %v275_v21 = vadd.f32 %v415_v19, %v211_v18  ;;  %v416_v22 = vld [vmem:[%s790_s5 + $0x7] ss:$0 sm:$0xff]  ;;  %282 = vst.msk [vmem:[%s796_s8 + $0x8] sm:$0x3] %vm277_vm0, %v273_v16 }
  0x58   : > { %283 = vst.msk [vmem:[%s796_s8 + $0xa] sm:$0x3] %vm277_vm0, %v274_v17  ;;  %v276_v23 = vadd.f32 %v416_v22, %v212_v20  ;;  %s287_s27 = scalar_lea.sflag [#allocation4], %s778_s30  ;;  %s538_s29 = scalar_lea.vmem %s821_s17, 256 }
  0x59   : > { %284 = vst.msk [vmem:[%s796_s8 + $0xc] sm:$0x3] %vm277_vm0, %v275_v21  ;;  %p539_p13 = scmp.ne.s32.totalorder %s821_s17, %s538_s29  ;;  %p894_p1 = scmp.ne.s32.totalorder %s889_s21, 0 }
  0x5a   : > { %285 = vst.msk [vmem:[%s796_s8 + $0xe] sm:$0x3] %vm277_vm0, %v276_v23  ;;  %s614_s13 = smov [#allocation7]  }
  0x5b   : > { %p540_p9 = pnand %p539_p13, %p894_p1  ;;  %s542_s6 = sshll.u32 %s614_s13, 4  ;;  %s543_s6 = int_to_ptr.vmem [resolvable:$false] %s542_s6 }
  0x5c   : > { %s544_s7 = scalar_lea.vmem %s543_s6, 512  ;;  %p545_p10 = scmp.lt.s32.totalorder %s821_s17, %s543_s6 }
  0x5d   : > { %p541_p7 = pneg %p540_p9  ;;  %p546_p0 = scmp.lt.s32.totalorder %s544_s7, %s538_s29 }
  0x5f   : > { %p547_p2 = por %p546_p0, %p545_p10 }
  0x61   : > { %p548_p4 = pnand %p547_p2, %p541_p7 }
  0x63   : > { %551 = shalt.err (!%p548_p4)
}
  0x64   : > { %s552_s14 = scalar_lea.hbm %s831_s26, 256  ;;  %s556_s19 = scalar_lea.hbm %s884_s2, 512 }
  0x65   : > { %p553_p3 = scmp.ne.s32.totalorder %s831_s26, %s552_s14  ;;  %p557_p12 = scmp.lt.s32.totalorder %s831_s26, %s884_s2 }
  0x66   : > { %p558_p8 = scmp.lt.s32.totalorder %s556_s19, %s552_s14 }
  0x67   : > { %p554_p5 = pnand %p553_p3, %p894_p1 }
  0x68   : > { %p559_p6 = por %p558_p8, %p557_p12 }
  0x69   : > { %p555_p11 = pneg %p554_p5 }
  0x6b   : > { %p560_p13 = pnand %p559_p6, %p555_p11 }
  0x6d   : > { %563 = shalt.err (!%p560_p13)
}
  0x6e   : > { %s615_s3 = smov 32   ;;  %s616_s5 = smov 2  }
  0x6f   : > { %429 = dma.vmem_to_hbm [thread:$0]  (%p894_p1), %s821_s17, 256, %s831_s26, %s287_s27, %s615_s3, %s615_s3, %s616_s5  }
  0x70 PF: > { %s315_s8 = sand.u32 1, %s594_s9   ;;  %p895_p9 = scmp.ne.s32.totalorder %s890_s22, 0 }
  0x71   : > { %p896_p7 = scmp.ge.s32.totalorder %s606_s12, 2  ;;  %s316_s28 = scalar_lea.sflag [#allocation4], %s315_s8 }
  0x73   : > { %p439_p10 = pnand %p896_p7, %p895_p9 }
  0x75   : > { %p440_p0 = pneg %p439_p10 }
  0x77   : > { %589 = dma.done.wait (%p440_p0), %s316_s28, 256  }
  0x78   : > { %591 = vsyncadd (%p440_p0), %s316_s28, 4294967040  ;;  %p18_p2 = scmp.ge.s32.totalorder %s657_s15, 4   ;;  %s897_s9 = smov %s598_s10 }
  0x79   : > { %s898_s10 = smov %s602_s11  ;;  %s899_s11 = smov %s669_s18 }
  0x7a   : > { %s900_s12 = smov %s657_s15  ;;  %20 = sbr.rel (!%p18_p2) target bundleno = 7 (0x7), region = 86 }
  0x7f   :  { %321 = vsyncpa [#allocation3], 1 }
  0x80   :  { %323 = vsyncpa [#allocation3 + $0x1], 1 }
  0x81   :  { %324 = vsyncpa [#allocation6], 1 }
  0x82   :  { %326 = vsyncpa [#allocation6 + $0x1], 1 }
  0x83   :  { %327 = vsyncpa [#allocation4], 1 }
  0x84   :  { %329 = vsyncpa [#allocation4 + $0x1], 1 }

</bundles_post_ra>
